<compile_context>
chip_gen: v5e
topology: v5e:2x2
jax: 0.10.0
libtpu: 0.0.40
codegen_flags: <defaults>
</compile_context>

<pallas_src>
import jax
import jax.numpy as jnp
from jax.experimental import pallas as pl
from jax.experimental.pallas import tpu as pltpu

_MIB = 1024 * 1024


# ---------------------------------------------------------------------------
# Generation-aware VMEM capacity (v5e/v6e: 128 MiB, v7x: 64 MiB per TC).
# ---------------------------------------------------------------------------
def _vmem_capacity_bytes():
    try:
        cap = getattr(pltpu.get_tpu_info(), "vmem_capacity_bytes", None)
        if cap:
            return int(cap)
    except Exception:
        pass
    return 64 * _MIB  # conservative fallback (v7x per-core VMEM)


# ---------------------------------------------------------------------------
# In-kernel channel-attention weights in column form (fused path only; runs
# once per batch so its cost is negligible).
#   a, m : (C, 1) pooled avg / max (channels on sublanes)
#   w1t  : (C, Cr) = fc1.weight.T ; w2 : (C, Cr) = fc2.weight
# fc2(relu(fc1 a)) + fc2(relu(fc1 m)) == fc2(relu_a + relu_m)  (no bias).
# Only VPU broadcasts + XLU reductions + one EUP exp — no MXU, no transposes.
# ---------------------------------------------------------------------------
def _attention_col(a, m, w1t, w2):
    h = (jnp.maximum(jnp.sum(w1t * a, axis=0, keepdims=True), 0.0)
         + jnp.maximum(jnp.sum(w1t * m, axis=0, keepdims=True), 0.0))   # (1, Cr)
    z = jnp.sum(w2 * h, axis=1, keepdims=True)                          # (C, 1)
    return 1.0 / (1.0 + jnp.exp(-z))                                    # (C, 1)


# ---------------------------------------------------------------------------
# Path A: fused single-pass kernel. grid=(B,): x crosses HBM once in, once out.
# No full-slab f32 temporary; rescale multiply stays in the input dtype.
# ---------------------------------------------------------------------------
def _make_fused_kernel(inv_hw):
    def kernel(x_ref, w1t_ref, w2_ref, o_ref):
        x = x_ref[0]                                                  # (C, HW) native dtype
        s = jnp.sum(x, axis=1, keepdims=True, dtype=jnp.float32)      # (C, 1) f32 accum
        mx = jnp.max(x, axis=1, keepdims=True).astype(jnp.float32)    # (C, 1)
        y = _attention_col(s * inv_hw, mx, w1t_ref[...], w2_ref[...]) # (C, 1) f32
        o_ref[0] = (x * y.astype(x.dtype)).astype(o_ref.dtype)
    return kernel


# ---------------------------------------------------------------------------
# Path B pass 1: per-(batch, channel) sum & max, accumulated over 128-aligned
# spatial tiles; the (possibly) partial last tile is masked in-kernel.
# ---------------------------------------------------------------------------
def _make_pool_kernel(tile, hw, need_mask):
    def kernel(x_ref, sum_ref, max_ref):
        t = pl.program_id(1)

        @pl.when(t == 0)
        def _():
            sum_ref[...] = jnp.zeros(sum_ref.shape, sum_ref.dtype)
            max_ref[...] = jnp.full(max_ref.shape, -jnp.inf, max_ref.dtype)

        x = x_ref[0].astype(jnp.float32)                              # (C, tile) small temp
        if need_mask:
            lane = jax.lax.broadcasted_iota(jnp.int32, x.shape, 1)
            valid = (t * tile + lane) < hw
            xs = jnp.where(valid, x, 0.0)
            xm = jnp.where(valid, x, -jnp.inf)
        else:
            xs, xm = x, x
        sum_ref[0] += jnp.sum(xs, axis=1, keepdims=True)
        max_ref[0] = jnp.maximum(max_ref[0], jnp.max(xm, axis=1, keepdims=True))
    return kernel


# ---------------------------------------------------------------------------
# Path B pass 2: pure streaming broadcast-multiply (MLP hoisted to XLA).
# OOB lanes of a partial last tile are computed on garbage and discarded by
# the bounded output writeback, so no mask is needed here.
# ---------------------------------------------------------------------------
def _scale_kernel(x_ref, y_ref, o_ref):
    x = x_ref[0]                                                      # (C, T) native dtype
    o_ref[0] = (x * y_ref[0].astype(x.dtype)).astype(o_ref.dtype)


# ---------------------------------------------------------------------------
# Spatial tile: derived from a VMEM tile budget and C, forced to a multiple of
# 128 (remainder handled with an in-kernel mask), never a "largest divisor".
# ~4 tiles live at once (double-buffered in + out).
# ---------------------------------------------------------------------------
def _derive_hw_tile(hw, c, itemsize, tile_budget_bytes):
    max_t = tile_budget_bytes // max(1, 4 * c * itemsize)
    if max_t >= hw:
        return hw
    t = max(128, (max_t // 128) * 128)
    return min(t, hw)


# ---------------------------------------------------------------------------
# Wrapper.  x: (B, C, H, W) NCHW; w1 = fc1.weight (C//r, C); w2 = fc2.weight (C, C//r)
# ---------------------------------------------------------------------------
def channel_attention_forward(x, w1, w2, *,
                              force_tiled=False,
                              tile_budget_bytes=8 * _MIB):
    B, C, H, W = x.shape
    Cr = w1.shape[0]
    HW = H * W
    inv_hw = 1.0 / float(HW)
    itemsize = jnp.dtype(x.dtype).itemsize

    x3 = x.reshape(B, C, HW)                              # free reshape (no transpose)
    w1t = jnp.transpose(w1).astype(jnp.float32)           # (C, Cr)
    w2f = w2.astype(jnp.float32)                          # (C, Cr)

    vmem_cap = _vmem_capacity_bytes()
    vmem_limit = int(0.85 * vmem_cap)                     # ~108 MiB v5e/v6e, ~54 MiB v7x
    fused_budget = int(0.70 * vmem_cap)                   # ~90 MiB v5e/v6e, ~45 MiB v7x

    # Fused working set: input slab (2x double-buffered) + output slab (2x) +
    # ~1 slab of in-kernel temporaries + resident weight blocks, in x's dtype.
    slab = C * HW * itemsize
    fused_bytes = 5 * slab + 4 * C * Cr * 4

    if not force_tiled and fused_bytes <= fused_budget:
        out3 = pl.pallas_call(
            _make_fused_kernel(inv_hw),
            grid=(B,),
            in_specs=[
                pl.BlockSpec((1, C, HW), lambda b: (b, 0, 0)),
                pl.BlockSpec((C, Cr), lambda b: (0, 0)),
                pl.BlockSpec((C, Cr), lambda b: (0, 0)),
            ],
            out_specs=pl.BlockSpec((1, C, HW), lambda b: (b, 0, 0)),
            out_shape=jax.ShapeDtypeStruct((B, C, HW), x.dtype),
            compiler_params=pltpu.CompilerParams(
                dimension_semantics=("parallel",),
                vmem_limit_bytes=vmem_limit),
        )(x3, w1t, w2f)
        return out3.reshape(B, C, H, W)

    # ---- two-pass tiled path (large slabs) ----
    T = _derive_hw_tile(HW, C, itemsize, tile_budget_bytes)
    nT = pl.cdiv(HW, T)
    need_mask = (HW % T) != 0

    s, m = pl.pallas_call(
        _make_pool_kernel(T, HW, need_mask),
        grid=(B, nT),
        in_specs=[pl.BlockSpec((1, C, T), lambda b, t: (b, 0, t))],
        out_specs=(
            pl.BlockSpec((1, C, 1), lambda b, t: (b, 0, 0)),
            pl.BlockSpec((1, C, 1), lambda b, t: (b, 0, 0)),
        ),
        out_shape=(
            jax.ShapeDtypeStruct((B, C, 1), jnp.float32),
            jax.ShapeDtypeStruct((B, C, 1), jnp.float32),
        ),
        compiler_params=pltpu.CompilerParams(
            dimension_semantics=("parallel", "arbitrary"),
            vmem_limit_bytes=vmem_limit),
    )(x3)

    # Hoisted tiny MLP + sigmoid: one XLA matmul pair over (B, C) — removes the
    # per-tile MLP recomputation and keeps the weights out of pass-2 VMEM.
    avg = s[:, :, 0] * inv_hw                             # (B, C)
    mx = m[:, :, 0]                                       # (B, C)
    h = jnp.maximum(avg @ w1t, 0.0) + jnp.maximum(mx @ w1t, 0.0)   # (B, Cr)
    y = jax.nn.sigmoid(h @ w2f.T)                         # (B, C)
    y3 = y[:, :, None].astype(jnp.float32)                # (B, C, 1)

    out3 = pl.pallas_call(
        _scale_kernel,
        grid=(B, nT),
        in_specs=[
            pl.BlockSpec((1, C, T), lambda b, t: (b, 0, t)),
            pl.BlockSpec((1, C, 1), lambda b, t: (b, 0, 0)),
        ],
        out_specs=pl.BlockSpec((1, C, T), lambda b, t: (b, 0, t)),
        out_shape=jax.ShapeDtypeStruct((B, C, HW), x.dtype),
        compiler_params=pltpu.CompilerParams(
            dimension_semantics=("parallel", "parallel"),
            vmem_limit_bytes=vmem_limit),
    )(x3, y3)
    return out3.reshape(B, C, H, W)


# ---------------------------------------------------------------------------
# Pure-JAX reference mirroring the PyTorch forward (NCHW).
# ---------------------------------------------------------------------------
def ref_forward(x, w1, w2):
    avg = x.mean(axis=(2, 3))                             # (B, C)
    mx = x.max(axis=(2, 3))                               # (B, C)

    def mlp(v):
        return jnp.maximum(v @ w1.T, 0.0) @ w2.T

    y = jax.nn.sigmoid(mlp(avg) + mlp(mx))                # (B, C)
    return x * y[:, :, None, None]


if __name__ == "__main__":
    key = jax.random.PRNGKey(0)
    kx, k1, k2, kx2 = jax.random.split(key, 4)

    B, C, H, W, reduction = 2, 4, 16, 16, 2
    Cr = C // reduction

    x = jax.random.normal(kx, (B, C, H, W), jnp.float32)
    w1 = 0.3 * jax.random.normal(k1, (Cr, C), jnp.float32)   # fc1.weight (Cr, C)
    w2 = 0.3 * jax.random.normal(k2, (C, Cr), jnp.float32)   # fc2.weight (C, Cr)

    ref = jax.block_until_ready(ref_forward(x, w1, w2))

    # fused single-pass path (default for shapes that fit the VMEM budget)
    out_fused = jax.block_until_ready(channel_attention_forward(x, w1, w2))
    assert out_fused.shape == (B, C, H, W), out_fused.shape
    err = float(jnp.max(jnp.abs(out_fused - ref)))
    assert err < 1e-4, f"fused path max abs err {err}"

    # force the two-pass tiled path (128-wide spatial tiles, aligned HW)
    out_tiled = jax.block_until_ready(
        channel_attention_forward(x, w1, w2, force_tiled=True,
                                  tile_budget_bytes=8192))
    err2 = float(jnp.max(jnp.abs(out_tiled - ref)))
    assert err2 < 1e-4, f"tiled path max abs err {err2}"

    # non-multiple-of-128 spatial -> exercises the masked partial last tile
    H2 = W2 = 18
    x2 = jax.random.normal(kx2, (B, C, H2, W2), jnp.float32)
    ref2 = jax.block_until_ready(ref_forward(x2, w1, w2))
    out_tiled2 = jax.block_until_ready(
        channel_attention_forward(x2, w1, w2, force_tiled=True,
                                  tile_budget_bytes=8192))
    err3 = float(jnp.max(jnp.abs(out_tiled2 - ref2)))
    assert err3 < 1e-4, f"masked tiled path max abs err {err3}"

    print("KERNEL_OK")
</pallas_src>

<mosaic_0001>
module attributes {stable_mosaic.version = 11 : i64} {
  func.func @kernel(%arg0: i32, %arg1: memref<1x4x256xf32, #tpu.memory_space<vmem>>, %arg2: memref<4x2xf32, #tpu.memory_space<vmem>>, %arg3: memref<4x2xf32, #tpu.memory_space<vmem>>, %arg4: memref<1x4x256xf32, #tpu.memory_space<vmem>>) attributes {dimension_semantics = [#tpu.dimension_semantics<parallel>], iteration_bounds = array<i64: 2>, scalar_prefetch = 0 : i64, scratch_operands = 0 : i64, tpu.core_type = #tpu.core_type<tc>, window_params = [{transform_indices = @transform_0, window_bounds = array<i64: 1, 4, 256>}, {pipeline_mode = #tpu.pipeline_mode<synchronous>, transform_indices = @transform_1, window_bounds = array<i64: 4, 2>}, {pipeline_mode = #tpu.pipeline_mode<synchronous>, transform_indices = @transform_2, window_bounds = array<i64: 4, 2>}, {transform_indices = @transform_3, window_bounds = array<i64: 1, 4, 256>}]} {
    %c0 = arith.constant 0 : index
    %c0_0 = arith.constant 0 : index
    %c0_1 = arith.constant 0 : index
    %0 = vector.load %arg1[%c0, %c0_0, %c0_1] : memref<1x4x256xf32, #tpu.memory_space<vmem>>, vector<1x4x256xf32>
    %1 = vector.shape_cast %0 : vector<1x4x256xf32> to vector<4x256xf32>
    %cst = arith.constant dense<0.000000e+00> : vector<4xf32>
    %2 = vector.multi_reduction <add>, %1, %cst [1] : vector<4x256xf32> to vector<4xf32>
    %3 = vector.shape_cast %2 : vector<4xf32> to vector<4x1xf32>
    %cst_2 = arith.constant dense<0xFF800000> : vector<4xf32>
    %4 = vector.multi_reduction <maximumf>, %1, %cst_2 [1] : vector<4x256xf32> to vector<4xf32>
    %5 = vector.shape_cast %4 : vector<4xf32> to vector<4x1xf32>
    %cst_3 = arith.constant 3.906250e-03 : f32
    %6 = vector.broadcast %cst_3 : f32 to vector<4x1xf32>
    %7 = arith.mulf %3, %6 : vector<4x1xf32>
    %c0_4 = arith.constant 0 : index
    %c0_5 = arith.constant 0 : index
    %8 = vector.load %arg2[%c0_4, %c0_5] : memref<4x2xf32, #tpu.memory_space<vmem>>, vector<4x2xf32>
    %c0_6 = arith.constant 0 : index
    %c0_7 = arith.constant 0 : index
    %9 = vector.load %arg3[%c0_6, %c0_7] : memref<4x2xf32, #tpu.memory_space<vmem>>, vector<4x2xf32>
    %10 = vector.broadcast %7 : vector<4x1xf32> to vector<4x2xf32>
    %11 = arith.mulf %8, %10 : vector<4x2xf32>
    %cst_8 = arith.constant dense<0.000000e+00> : vector<2xf32>
    %12 = vector.multi_reduction <add>, %11, %cst_8 [0] : vector<4x2xf32> to vector<2xf32>
    %13 = vector.shape_cast %12 : vector<2xf32> to vector<1x2xf32>
    %cst_9 = arith.constant 0.000000e+00 : f32
    %14 = vector.broadcast %cst_9 : f32 to vector<1x2xf32>
    %15 = arith.maximumf %13, %14 : vector<1x2xf32>
    %16 = vector.broadcast %5 : vector<4x1xf32> to vector<4x2xf32>
    %17 = arith.mulf %8, %16 : vector<4x2xf32>
    %cst_10 = arith.constant dense<0.000000e+00> : vector<2xf32>
    %18 = vector.multi_reduction <add>, %17, %cst_10 [0] : vector<4x2xf32> to vector<2xf32>
    %19 = vector.shape_cast %18 : vector<2xf32> to vector<1x2xf32>
    %cst_11 = arith.constant 0.000000e+00 : f32
    %20 = vector.broadcast %cst_11 : f32 to vector<1x2xf32>
    %21 = arith.maximumf %19, %20 : vector<1x2xf32>
    %22 = arith.addf %15, %21 : vector<1x2xf32>
    %23 = vector.broadcast %22 : vector<1x2xf32> to vector<4x2xf32>
    %24 = arith.mulf %9, %23 : vector<4x2xf32>
    %cst_12 = arith.constant dense<0.000000e+00> : vector<4xf32>
    %25 = vector.multi_reduction <add>, %24, %cst_12 [1] : vector<4x2xf32> to vector<4xf32>
    %26 = vector.shape_cast %25 : vector<4xf32> to vector<4x1xf32>
    %cst_13 = arith.constant 0.000000e+00 : f32
    %27 = vector.broadcast %cst_13 : f32 to vector<4x1xf32>
    %28 = arith.subf %27, %26 : vector<4x1xf32>
    %29 = math.exp %28 : vector<4x1xf32>
    %cst_14 = arith.constant 1.000000e+00 : f32
    %30 = vector.broadcast %cst_14 : f32 to vector<4x1xf32>
    %31 = arith.addf %30, %29 : vector<4x1xf32>
    %cst_15 = arith.constant 1.000000e+00 : f32
    %32 = vector.broadcast %cst_15 : f32 to vector<4x1xf32>
    %33 = arith.divf %32, %31 : vector<4x1xf32>
    %34 = vector.broadcast %33 : vector<4x1xf32> to vector<4x256xf32>
    %35 = arith.mulf %1, %34 : vector<4x256xf32>
    %c0_16 = arith.constant 0 : index
    %c0_17 = arith.constant 0 : index
    %c0_18 = arith.constant 0 : index
    %36 = vector.load %arg4[%c0_16, %c0_17, %c0_18] : memref<1x4x256xf32, #tpu.memory_space<vmem>>, vector<1x4x256xf32>
    %37 = vector.shape_cast %36 : vector<1x4x256xf32> to vector<4x256xf32>
    %38 = vector.shape_cast %35 : vector<4x256xf32> to vector<1x4x256xf32>
    tpu.vector_store %arg4[%c0_16, %c0_17, %c0_18], %38 {strides = array<i32>} : memref<1x4x256xf32, #tpu.memory_space<vmem>>, vector<1x4x256xf32>,
    return
  }
  func.func @transform_0(%arg0: i32) -> (i32, i32, i32) {
    %c0_i32 = arith.constant 0 : i32
    %c0_i32_0 = arith.constant 0 : i32
    %c0_i32_1 = arith.constant 0 : i32
    return %arg0, %c0_i32, %c0_i32_0 : i32, i32, i32
  }
  func.func @transform_1(%arg0: i32) -> (i32, i32) {
    %c0_i32 = arith.constant 0 : i32
    %c0_i32_0 = arith.constant 0 : i32
    %c0_i32_1 = arith.constant 0 : i32
    return %c0_i32, %c0_i32_0 : i32, i32
  }
  func.func @transform_2(%arg0: i32) -> (i32, i32) {
    %c0_i32 = arith.constant 0 : i32
    %c0_i32_0 = arith.constant 0 : i32
    %c0_i32_1 = arith.constant 0 : i32
    return %c0_i32, %c0_i32_0 : i32, i32
  }
  func.func @transform_3(%arg0: i32) -> (i32, i32, i32) {
    %c0_i32 = arith.constant 0 : i32
    %c0_i32_0 = arith.constant 0 : i32
    %c0_i32_1 = arith.constant 0 : i32
    return %arg0, %c0_i32, %c0_i32_0 : i32, i32, i32
  }
}

</mosaic_0001>

<bundles_post_ra>
// kernel: tpu_custom_call.1
= control target key start
LH: loop header
LB: loop body
LE: loop exit
PB: predicated region body
PF: predicated region fallthrough
CT: control target
= control target key end

     0   :  { %8 = vsyncpa [#allocation3], 0  ;;  %s684_s0 = inlined_call_operand.hbm [shape: f32[2,4,256], index: 0, kind: input, shape index: {}]   ;;  %s685_s1 = inlined_call_operand.vmem [shape: f32[4,2], index: 1, kind: input, shape index: {}]   ;;  %s686_s2 = inlined_call_operand.vmem [shape: f32[4,2], index: 2, kind: input, shape index: {}]   ;;  %s687_s3 = inlined_call_operand.hbm [shape: f32[2,4,256], index: 3, kind: output, shape index: {}]  }
   0x1   :  { %10 = vsyncpa [#allocation3 + $0x1], 0 }
   0x2   :  { %11 = vsyncpa [#allocation4], 0 }
   0x3   :  { %13 = vsyncpa [#allocation4 + $0x1], 0  ;;  %s539_s12 = smov 0   ;;  %s541_s13 = smov 0  }
   0x4   :  { %s543_s14 = smov 0   ;;  %s545_s15 = smov 0  }
   0x5 LB: > { %s560_s16 = sadd.s32 4294967295, %s516_s15   ;;  %s353_s17 = sadd.s32 4294967294, %s516_s15   ;;  %s516_s15 = sphi %s545_s15, %s697_s15   ;;  %s512_s14 = sphi %s543_s14, %s696_s14   ;;  %s508_s13 = sphi %s541_s13, %s695_s13   ;;  %s504_s12 = sphi %s539_s12, %s694_s12  }
   0x6   : > { %s564_s18 = sadd.s32 1, %s516_s15   ;;  %s26_s19 = sadd.s32 1, %s512_s14 }
   0x7   : > { %s23_s20 = ssub.s32 %s516_s15, %s564_s18  ;;  %p33_p0 = scmp.ne.s32.totalorder %s512_s14, %s508_s13 }
   0x8   : > { %p24_p1 = scmp.eq.s32.totalorder %s23_s20, 0  ;;  %p34_p2 = scmp.eq.s32.totalorder %s516_s15, 0 }
   0x9   : > { %p39_p3 = scmp.ne.s32.totalorder %s508_s13, %s504_s12  ;;  %p40_p4 = scmp.eq.s32.totalorder %s560_s16, 0 }
   0xa   : > { %s576_s21 = scalar_select %p24_p1, %s512_s14, %s26_s19  }
   0xb   : > { %p578_p5 = por %p34_p2, %p33_p0  ;;  %p582_p6 = por %p40_p4, %p39_p3 }
   0xc   : > { %p105_p7 = scmp.eq.s32.totalorder %s560_s16, 1  ;;  %p111_p8 = scmp.eq.s32.totalorder %s353_s17, 1 }
   0xd   : > { %p381_p10 = scmp.lt.s32.totalorder %s516_s15, 2  ;;  %s137_s26 = sand.u32 1, %s512_s14  }
   0xe   : > { %p589_p11 = por %p105_p7, %p33_p0  ;;  %p593_p12 = por %p111_p8, %p39_p3 }
   0xf   : > { %s367_s27 = sshll.u32 %s516_s15, 3  ;;  %s356_s28 = sshll.u32 %s137_s26, 3 }
  0x10   : > { %s146_s4 = scalar_lea.hbm %s684_s0, %s367_s27  ;;  %s141_s6 = scalar_lea.vmem [#allocation2], %s356_s28 }
  0x11   : > { %s148_s5 = sshll.u32 %s146_s4, 4  ;;  %s150_s7 = sshll.u32 %s141_s6, 4  ;;  %s149_s5 = int_to_ptr.hbm [resolvable:$true] %s148_s5  ;;  %s151_s7 = int_to_ptr.vmem [resolvable:$true] %s150_s7 }
  0x12   : > { %p604_p13 = pnand %p381_p10, %p578_p5  ;;  %p359_p0 = scmp.ge.s32.totalorder %s516_s15, 1 }
  0x13   : > { %p155_p1 = scmp.lt.s32.totalorder %s516_s15, 3  ;;  %s138_s9 = scalar_lea.sflag [#allocation3], %s137_s26 }
  0x14   : > { %s420_s10 = sshra.s32 %s149_s5, 4  ;;  %p424_p3 = pneg %p604_p13  ;;  %s421_s10 = int_to_ptr.hbm [resolvable:$true] %s420_s10 }
  0x15   : > { %s422_s11 = scalar_lea.hbm %s421_s10, 8  ;;  %s427_s20 = scalar_lea.hbm %s684_s0, 16 }
  0x16   : > { %p423_p2 = scmp.ne.s32.totalorder %s421_s10, %s422_s11  ;;  %p428_p5 = scmp.lt.s32.totalorder %s421_s10, %s684_s0 }
  0x17   : > { %p429_p8 = scmp.lt.s32.totalorder %s427_s20, %s422_s11 }
  0x18   : > { %p425_p4 = pnand %p424_p3, %p423_p2 }
  0x19   : > { %p430_p10 = por %p429_p8, %p428_p5 }
  0x1a   : > { %p426_p7 = pneg %p425_p4 }
  0x1c   : > { %p431_p9 = pnand %p430_p10, %p426_p7 }
  0x1e   : > { %434 = shalt.err (!%p431_p9)
}
  0x1f   : > { %376 = dma.hbm_to_vmem [thread:$0]  (!%p604_p13), %s149_s5, 128, %s151_s7, %s138_s9  }
  0x20   : > { %p156_p2 = pnand %p359_p0, %p155_p1 }
  0x21   : > { %s625_s26 = sand.u32 (!%p156_p2), 1, %s508_s13  }
  0x22   : > { %159 = sbr.rel (%p156_p2) target bundleno = 351 (0x15f), region = 32  ;;  %s360_s28 = sshll.u32 (!%p156_p2), %s625_s26, 3 }
  0x23   : > { %s162_s29 = scalar_lea.sflag (!%p156_p2), [#allocation3], %s625_s26  ;;  %s165_s30 = scalar_lea.vmem (!%p156_p2), [#allocation2], %s360_s28 }
  0x27   : > { %495 = dma.done.wait (%p582_p6), %s162_s29, 128  }
  0x28   : > { %497 = vsyncadd (%p582_p6), %s162_s29, 4294967168  ;;  %v635_v0 = vld [vmem:[%s165_s30] sm:$0xff]  ;;  %vm196_vm0 = vcmask 1043456   ;;  %v213_v12 = vld [vmem:[%s685_s1] sm:$0xf]  ;;  %vm216_vm1 = vcmask 11264  }
  0x29   : > { %191 = vst [vmem:[#allocation1] ss:$2 sm:$0xff] %v635_v0  ;;  %v214_v33 = vld [vmem:[%s686_s2] sm:$0xf]  ;;  %v518_v45 = vmov 839922192  }
  0x2a   : > { %v260_v46 = vunpack.c.l.s4 %v518_v45  ;;  %s368_s7 = sshll.u32 %s560_s16, 3  ;;  %s188_s11 = scalar_lea.vmem [#allocation5], %s360_s28 }
  0x2b   : > { %s278_s10 = scalar_lea.hbm %s687_s3, %s368_s7  ;;  %s280_s16 = sshll.u32 %s188_s11, 4  ;;  %s281_s16 = int_to_ptr.vmem [resolvable:$true] %s280_s16 }
  0x2c   : > { %v261_v51 = vunpack.c.0.s8 %v260_v46  ;;  %s282_s17 = sshll.u32 %s278_s10, 4  ;;  %s267_s19 = scalar_lea.sflag [#allocation4], %s625_s26  ;;  %s283_s17 = int_to_ptr.hbm [resolvable:$true] %s282_s17 }
  0x2d   : > { %s464_s20 = sshra.s32 %s283_s17, 4  ;;  %s470_s28 = scalar_lea.hbm %s687_s3, 16  ;;  %s465_s20 = int_to_ptr.hbm [resolvable:$true] %s464_s20 }
  0x2e   : > { %s466_s22 = scalar_lea.hbm %s465_s20, 8  ;;  %p471_p0 = scmp.lt.s32.totalorder %s465_s20, %s687_s3 }
  0x2f   : > { %p467_p6 = scmp.ne.s32.totalorder %s465_s20, %s466_s22  ;;  %p472_p1 = scmp.lt.s32.totalorder %s470_s28, %s466_s22 }
  0x30   : > { %v192_v1 = vld.sshfl [vmem:[#allocation1] sm:$0xff pattern:$0x75316420]  ;;  %v193_v2 = vld.sshfl [vmem:[#allocation1 + $0x8] sm:$0xff pattern:$0x75316420] }
  0x31   : > { %v197_v3 = vsel %vm196_vm0, %v192_v1, 0.0  ;;  %v198_v4 = vsel %vm196_vm0, %v193_v2, 0.0  ;;  %202 = vst [vmem:[#allocation1] ss:$2 sm:$0xff] %v635_v0  ;;  %p468_p9 = pnand %p467_p6, %p589_p11  ;;  %p473_p3 = por %p472_p1, %p471_p0 }
  0x32   : > { %v199_v5 = vadd.f32 %v198_v4, %v197_v3 }
  0x33   : > { %p469_p13 = pneg %p468_p9 }
  0x34   : > { %200 = vadd.xlane.f32.xlu0 %v199_v5 }
  0x35   : > { %p474_p4 = pnand %p473_p3, %p469_p13 }
  0x38   : > { %v203_v6 = vld.sshfl [vmem:[#allocation1] sm:$0xff pattern:$0x75316420]  ;;  %v204_v7 = vld.sshfl [vmem:[#allocation1 + $0x8] sm:$0xff pattern:$0x75316420] }
  0x39   : > { %v207_v8 = vsel %vm196_vm0, %v203_v6, -inf  ;;  %v208_v9 = vsel %vm196_vm0, %v204_v7, -inf }
  0x3a   : > { %v209_v10 = vmax.f32 %v207_v8, %v208_v9 }
  0x3c   : > { %210 = vmax.xlane.f32.xlu0 %v209_v10 }
  0xa7   : > { %v201_v11 = vpop.xlane.xlu0 %200 }
  0xa8   : > { %v212_v13 = vmul.f32 0.00390625, %v201_v11 }
  0xaa   : > { %v215_v14 = vmul.f32 %v213_v12, %v212_v13 }
  0xac   : > { %v217_v15 = vsel %vm216_vm1, %v215_v14, 0.0 }
  0xad   : > { %v218_v16 = vrot.slane %v217_v15, 4 }
  0xaf   : > { %v211_v17 = vpop.xlane.xlu0 %210  ;;  %v219_v18 = vadd.f32 %v218_v16, %v217_v15 }
  0xb0   : > { %v225_v19 = vmul.f32 %v213_v12, %v211_v17 }
  0xb1   : > { %v220_v20 = vrot.slane %v219_v18, 2 }
  0xb2   : > { %v226_v21 = vsel %vm216_vm1, %v225_v19, 0.0 }
  0xb3   : > { %v221_v22 = vadd.f32 %v220_v20, %v219_v18  ;;  %v227_v23 = vrot.slane %v226_v21, 4 }
  0xb5   : > { %v228_v24 = vadd.f32 %v227_v23, %v226_v21  ;;  %v222_v25 = vrot.slane %v221_v22, 1 }
  0xb7   : > { %v229_v26 = vrot.slane %v228_v24, 2  ;;  %v223_v28 = vadd.f32 %v222_v25, %v221_v22 }
  0xb9   : > { %v230_v27 = vadd.f32 %v229_v26, %v228_v24  ;;  %v224_v31 = vmax.f32 %v223_v28, 0.0 }
  0xbb   : > { %v231_v29 = vrot.slane %v230_v27, 1 }
  0xbd   : > { %v232_v30 = vadd.f32 %v231_v29, %v230_v27 }
  0xbf   : > { %v233_v32 = vmax.f32 %v232_v30, 0.0 }
  0xc1   : > { %v234_v34 = vadd.f32 %v233_v32, %v224_v31 }
  0xc3   : > { %v235_v35 = vmul.f32 %v234_v34, %v214_v33 }
  0xc5   : > { %v236_v36 = vsel %vm216_vm1, %v235_v35, 0.0 }
  0xc6   : > { %237 = vadd.xlane.f32.xlu1 %v236_v36 }
 0x139   : > { %v238_v37 = vpop.xlane.xlu1 %237 }
 0x13a   : > { %v239_v38 = vsub.f32 0.0, %v238_v37 }
 0x13c   : > { %v240_v39 = vmul.f32 1.442695, %v239_v38 }
 0x13e   : > { %416 = vpow2.f32 %v240_v39 }
 0x144   : > { %v417_v40 = vpop.eup %416 }
 0x145   : > { %v242_v41 = vadd.f32 1.0, %v417_v40 }
 0x147   : > { %418 = vrcp.f32 %v242_v41  ;;  %v254_v47 = vand.u32 2147483648, %v242_v41  ;;  %v252_v49 = vand.u32 2147483647, %v242_v41  ;;  %vm248_vm3 = vweird.f32 %v242_v41 }
 0x149   : > { %v255_v52 = vor.u32 1.1754944e-38, %v254_v47  ;;  %vm253_vm5 = vcmp.eq.f32.partialorder %v252_v49, 8.507059e+37 }
 0x14d   : > { %v419_v42 = vpop.eup %418 }
 0x14e   : > { %v244_v43 = vmul.f32 %v419_v42, %v242_v41  ;;  %vm249_vm2 = vweird.f32 %v419_v42 }
 0x14f   : > { %vm250_vm4 = vmor %vm248_vm3, %vm249_vm2 }
 0x150   : > { %v245_v44 = vsub.f32 1.0, %v244_v43 }
 0x152   : > { %v246_v48 = vmul.f32 %v419_v42, %v245_v44 }
 0x154   : > { %v247_v50 = vadd.f32 %v419_v42, %v246_v48 }
 0x156   : > { %v251_v53 = vsel %vm250_vm4, %v419_v42, %v247_v50 }
 0x157   : > { %v256_v54 = vsel %vm253_vm5, %v255_v52, %v251_v53 }
 0x158   : > { %v262_v55 = vperm.slane %v256_v54, %v261_v51 }
 0x15a   : > { %v264_v56 = vmul.f32 %v262_v55, %v635_v0 }
 0x15c   : > { %265 = vst [vmem:[%s188_s11] sm:$0xff] %v264_v56 }
 0x15d   : > { %477 = shalt.err (!%p474_p4)
}
 0x15e   : > { %371 = dma.vmem_to_hbm [thread:$0]  (%p589_p11), %s281_s16, 128, %s283_s17, %s267_s19  }
 0x15f PF: > { %s294_s26 = sand.u32 1, %s504_s12   ;;  %p693_p7 = scmp.ge.s32.totalorder %s516_s15, 2 }
 0x160   : > { %s295_s4 = scalar_lea.sflag [#allocation4], %s294_s26 }
 0x161   : > { %p378_p5 = pnand %p693_p7, %p593_p12 }
 0x163   : > { %p379_p8 = pneg %p378_p5 }
 0x165   : > { %499 = dma.done.wait (%p379_p8), %s295_s4, 128  }
 0x166   : > { %501 = vsyncadd (%p379_p8), %s295_s4, 4294967168  ;;  %p16_p10 = scmp.ge.s32.totalorder %s564_s18, 4   ;;  %s694_s12 = smov %s508_s13 }
 0x167   : > { %s695_s13 = smov %s512_s14  ;;  %s696_s14 = smov %s576_s21 }
 0x168   : > { %s697_s15 = smov %s564_s18  ;;  %18 = sbr.rel (!%p16_p10) target bundleno = 5 (0x5), region = 77 }
 0x16d   :  { %301 = vsyncpa [#allocation3], 1 }
 0x16e   :  { %303 = vsyncpa [#allocation3 + $0x1], 1 }
 0x16f   :  { %304 = vsyncpa [#allocation4], 1 }
 0x170   :  { %306 = vsyncpa [#allocation4 + $0x1], 1 }

</bundles_post_ra>
